<compile_context>
chip_gen: v6e
topology: v6e:2x2x1
jax: 0.10.0
libtpu: 0.0.40
codegen_flags: <defaults>
</compile_context>

<pallas_src>
import math

import jax
import jax.numpy as jnp
from jax.experimental import pallas as pl
from jax.experimental.pallas import tpu as pltpu


def _round_up(x: int, m: int) -> int:
    return (x + m - 1) // m * m


def _pairwise_output_kernel(x_ref, w_ref, b_ref, r_ref, o_ref):
    # x_ref: (tm, H)   w_ref: (H, I)   b_ref: (1, I) f32   r_ref/o_ref: (tm, I)
    # Operands go straight to the MXU; accumulate in f32, fuse bias + residual,
    # cast once to the output dtype.
    acc = jnp.dot(x_ref[...], w_ref[...], preferred_element_type=jnp.float32)
    acc = acc + b_ref[...] + r_ref[...].astype(jnp.float32)
    o_ref[...] = acc.astype(o_ref.dtype)


def prepare_pairwise_output_params(weight, bias, *, param_dtype=None):
    """Hoisted, once-per-model parameter prep (NOT in the per-call path).

    weight: (pairwise_size, pairwise_intermediate_size)  -- torch nn.Linear layout
    bias:   (pairwise_size,)
    param_dtype: optional storage dtype for the transposed weight (e.g.
      jnp.bfloat16 when activations / residual / output run in bf16).

    Returns (w_t, bias2d): w_t is (H, I) pre-transposed, bias2d is (1, I) f32.
    """
    I, H = weight.shape
    dtype = weight.dtype if param_dtype is None else param_dtype
    w_t = jnp.asarray(weight.T, dtype=dtype)                 # (H, I)
    bias2d = jnp.asarray(bias, dtype=jnp.float32).reshape(1, I)
    return w_t, bias2d


def ribonanzanet_pairwise_output(hidden_states, input_tensor, w_t, bias2d,
                                 *, tm=1024):
    """hidden_states: (..., H)  input_tensor: (..., I)  -> (..., I).

    w_t:    (H, I) pre-transposed weight (see prepare_pairwise_output_params).
    bias2d: (1, I) f32 bias.
    tm:     row tile; sweep 512/1024/2048 (mem-bound streaming kernel).
    For best HBM efficiency run hidden_states / input_tensor (and hence the
    output) in bf16 where the model allows; the MXU accumulator stays f32.
    """
    *lead, H = hidden_states.shape
    I = input_tensor.shape[-1]
    assert w_t.shape == (H, I), (w_t.shape, (H, I))
    M = int(math.prod(lead)) if lead else 1

    x2d = hidden_states.reshape(M, H)          # metadata reshape, no copy
    r2d = input_tensor.reshape(M, I)
    out_dtype = hidden_states.dtype

    tm = _round_up(max(tm, 8), 8)
    if M < 8:
        tm_eff = max(M, 1)                     # block == full (tiny) row dim
    else:
        # >= 2 grid steps whenever M allows so both v7x TensorCores get work;
        # 8-row alignment keeps the block sublane-legal on a ragged M.
        tm_eff = max(8, min(tm, _round_up(pl.cdiv(M, 2), 8)))
    grid_m = pl.cdiv(M, tm_eff)

    bytes_accessed = (
        M * H * x2d.dtype.itemsize            # activations read
        + H * I * w_t.dtype.itemsize          # weight read (once)
        + I * bias2d.dtype.itemsize           # bias read (once)
        + M * I * r2d.dtype.itemsize          # residual read
        + M * I * jnp.dtype(out_dtype).itemsize)  # output write

    out2d = pl.pallas_call(
        _pairwise_output_kernel,
        out_shape=jax.ShapeDtypeStruct((M, I), out_dtype),
        grid_spec=pltpu.PrefetchScalarGridSpec(
            num_scalar_prefetch=0,
            grid=(grid_m,),
            in_specs=[
                # Activations: tiled over rows (ragged boundary handled by
                # Pallas; rows are independent so the partial tile is safe).
                pl.BlockSpec((tm_eff, H), lambda i: (i, 0)),
                # Weight: constant index_map -> DMA'd once, stays resident.
                pl.BlockSpec((H, I), lambda i: (0, 0)),
                # Bias (f32), constant.
                pl.BlockSpec((1, I), lambda i: (0, 0)),
                # Residual: tiled over rows, native width (no lane padding).
                pl.BlockSpec((tm_eff, I), lambda i: (i, 0)),
            ],
            out_specs=pl.BlockSpec((tm_eff, I), lambda i: (i, 0)),
        ),
        compiler_params=pltpu.CompilerParams(
            dimension_semantics=("parallel",),
        ),
        cost_estimate=pl.CostEstimate(
            flops=2 * M * H * I,
            transcendentals=0,
            bytes_accessed=bytes_accessed),
    )(x2d, w_t, bias2d, r2d)

    return out2d.reshape(tuple(lead) + (I,))


def _reference(hidden_states, input_tensor, weight, bias):
    y = jnp.einsum("...h,ih->...i", hidden_states, weight,
                   precision=jax.lax.Precision.HIGHEST)
    return y + bias + input_tensor


if __name__ == "__main__":
    # Small config consistent with the module: pairwise maps are (B, L, L, C).
    batch, seq = 2, 8
    pairwise_intermediate_size = 128   # input feature dim of the dense layer
    pairwise_size = 64                 # output feature dim (and residual dim)

    key = jax.random.PRNGKey(0)
    kx, kr, kw, kb = jax.random.split(key, 4)

    hidden_states = jax.random.normal(
        kx, (batch, seq, seq, pairwise_intermediate_size), dtype=jnp.float32)
    input_tensor = jax.random.normal(
        kr, (batch, seq, seq, pairwise_size), dtype=jnp.float32)

    # Deterministic "nn.Linear"-style init (torch layout: (out, in)).
    bound = 1.0 / math.sqrt(pairwise_intermediate_size)
    weight = jax.random.uniform(kw, (pairwise_size, pairwise_intermediate_size),
                                dtype=jnp.float32, minval=-bound, maxval=bound)
    bias = jax.random.uniform(kb, (pairwise_size,), dtype=jnp.float32,
                              minval=-bound, maxval=bound)

    # One-time parameter prep (pre-transpose) outside the per-call path.
    w_t, bias2d = prepare_pairwise_output_params(weight, bias)

    out = ribonanzanet_pairwise_output(hidden_states, input_tensor, w_t, bias2d)
    out = jax.block_until_ready(out)

    ref = _reference(hidden_states, input_tensor, weight, bias)
    assert out.shape == (batch, seq, seq, pairwise_size)
    assert jnp.allclose(out, ref, atol=1e-4, rtol=1e-4), "mismatch vs reference"

    print("KERNEL_OK")
</pallas_src>

<mosaic_0001>
module attributes {stable_mosaic.version = 11 : i64} {
  func.func @_pairwise_output_kernel(%arg0: i32, %arg1: memref<64x128xf32, #tpu.memory_space<vmem>>, %arg2: memref<128x64xf32, #tpu.memory_space<vmem>>, %arg3: memref<1x64xf32, #tpu.memory_space<vmem>>, %arg4: memref<64x64xf32, #tpu.memory_space<vmem>>, %arg5: memref<64x64xf32, #tpu.memory_space<vmem>>) attributes {dimension_semantics = [#tpu.dimension_semantics<parallel>], iteration_bounds = array<i64: 2>, scalar_prefetch = 0 : i64, scratch_operands = 0 : i64, tpu.core_type = #tpu.core_type<tc>, window_params = [{transform_indices = @transform_0, window_bounds = array<i64: 64, 128>}, {pipeline_mode = #tpu.pipeline_mode<synchronous>, transform_indices = @transform_1, window_bounds = array<i64: 128, 64>}, {pipeline_mode = #tpu.pipeline_mode<synchronous>, transform_indices = @transform_2, window_bounds = array<i64: 1, 64>}, {transform_indices = @transform_3, window_bounds = array<i64: 64, 64>}, {transform_indices = @transform_4, window_bounds = array<i64: 64, 64>}]} {
    %c0 = arith.constant 0 : index
    %c0_0 = arith.constant 0 : index
    %0 = vector.load %arg1[%c0, %c0_0] : memref<64x128xf32, #tpu.memory_space<vmem>>, vector<64x128xf32>
    %c0_1 = arith.constant 0 : index
    %c0_2 = arith.constant 0 : index
    %1 = vector.load %arg2[%c0_1, %c0_2] : memref<128x64xf32, #tpu.memory_space<vmem>>, vector<128x64xf32>
    %cst = arith.constant dense<0.000000e+00> : vector<64x64xf32>
    %2 = tpu.matmul %0, %1, %cst {dimension_numbers = #tpu.dot_dimension_numbers<[1], [0], [0], [1], [0, 0, 1, 1], [], []>} : vector<64x128xf32>, vector<128x64xf32>, vector<64x64xf32> -> vector<64x64xf32>
    %c0_3 = arith.constant 0 : index
    %c0_4 = arith.constant 0 : index
    %3 = vector.load %arg3[%c0_3, %c0_4] : memref<1x64xf32, #tpu.memory_space<vmem>>, vector<1x64xf32>
    %4 = vector.broadcast %3 : vector<1x64xf32> to vector<64x64xf32>
    %5 = arith.addf %2, %4 : vector<64x64xf32>
    %c0_5 = arith.constant 0 : index
    %c0_6 = arith.constant 0 : index
    %6 = vector.load %arg4[%c0_5, %c0_6] : memref<64x64xf32, #tpu.memory_space<vmem>>, vector<64x64xf32>
    %7 = arith.addf %5, %6 : vector<64x64xf32>
    %c0_7 = arith.constant 0 : index
    %c0_8 = arith.constant 0 : index
    %8 = vector.load %arg5[%c0_7, %c0_8] : memref<64x64xf32, #tpu.memory_space<vmem>>, vector<64x64xf32>
    tpu.vector_store %arg5[%c0_7, %c0_8], %7 {strides = array<i32>} : memref<64x64xf32, #tpu.memory_space<vmem>>, vector<64x64xf32>,
    return
  }
  func.func @transform_0(%arg0: i32) -> (i32, i32) {
    %c0_i32 = arith.constant 0 : i32
    %c0_i32_0 = arith.constant 0 : i32
    return %arg0, %c0_i32 : i32, i32
  }
  func.func @transform_1(%arg0: i32) -> (i32, i32) {
    %c0_i32 = arith.constant 0 : i32
    %c0_i32_0 = arith.constant 0 : i32
    %c0_i32_1 = arith.constant 0 : i32
    return %c0_i32, %c0_i32_0 : i32, i32
  }
  func.func @transform_2(%arg0: i32) -> (i32, i32) {
    %c0_i32 = arith.constant 0 : i32
    %c0_i32_0 = arith.constant 0 : i32
    %c0_i32_1 = arith.constant 0 : i32
    return %c0_i32, %c0_i32_0 : i32, i32
  }
  func.func @transform_3(%arg0: i32) -> (i32, i32) {
    %c0_i32 = arith.constant 0 : i32
    %c0_i32_0 = arith.constant 0 : i32
    return %arg0, %c0_i32 : i32, i32
  }
  func.func @transform_4(%arg0: i32) -> (i32, i32) {
    %c0_i32 = arith.constant 0 : i32
    %c0_i32_0 = arith.constant 0 : i32
    return %arg0, %c0_i32 : i32, i32
  }
}

</mosaic_0001>

<bundles_post_ra>
// kernel: tpu_custom_call.1
= control target key start
LH: loop header
LB: loop body
LE: loop exit
PB: predicated region body
PF: predicated region fallthrough
CT: control target
= control target key end

     0   :  { %s607_s15 = smov 0   ;;  %s713_s0 = inlined_call_operand.vmem [shape: f32[128,128], index: 0, kind: input, shape index: {}]   ;;  %s714_s1 = inlined_call_operand.vmem [shape: f32[128,64], index: 1, kind: input, shape index: {}]   ;;  %s715_s2 = inlined_call_operand.vmem [shape: f32[1,64], index: 2, kind: input, shape index: {}]   ;;  %s716_s3 = inlined_call_operand.vmem [shape: f32[128,64], index: 3, kind: input, shape index: {}]   ;;  %s717_s4 = inlined_call_operand.vmem [shape: f32[128,64], index: 4, kind: output, shape index: {}]  }
   0x1 LB: > { %s452_s16 = sadd.s32 4294967295, %s580_s15   ;;  %p456_p0 = scmp.ge.s32.totalorder %s580_s15, 1  ;;  %s580_s15 = sphi %s607_s15, %s14_s15  }
   0x2   : > { %p174_p1 = scmp.lt.s32.totalorder %s580_s15, 3 }
   0x4   : > { %p175_p2 = pnand %p456_p0, %p174_p1 }
   0x5   : > { %s457_s7 = sshll.u32 (!%p175_p2), %s452_s16, 3 }
   0x6   : > { %178 = sbr.rel (%p175_p2) target bundleno = 249 (0xf9), region = 36  ;;  %p206_p3 = scmp.lt.s32.totalorder (!%p175_p2), %s457_s7, 15 }
   0xb   : > { %v246_v0 = vld [vmem:[%s714_s1 + $0x78] sm:$0xff]  ;;  %v245_v1 = vld [vmem:[%s714_s1 + $0x70] sm:$0xff]  ;;  %v244_v2 = vld [vmem:[%s714_s1 + $0x68] sm:$0xff]  ;;  %s719_s7 = smov (!%p206_p3, %s457_s7), 15  ;;  %vm375_vm0 = vcmask 523264  }
   0xc   : > { %490 = vmatprep.subr.mxu0 %v246_v0  ;;  %534 = vmatprep.subr.mxu1 %v246_v0  ;;  %v243_v3 = vld [vmem:[%s714_s1 + $0x60] sm:$0xff]  ;;  %v242_v4 = vld [vmem:[%s714_s1 + $0x58] sm:$0xff]  ;;  %v241_v5 = vld [vmem:[%s714_s1 + $0x50] sm:$0xff]  ;;  %s659_s21 = sshll.u32 %s719_s7, 3 }
   0xd   : > { %491 = vmatpush3.msra.mxu0 %v246_v0  ;;  %550 = vmatpush3.msra.mxu1 %v246_v0  ;;  %v240_v6 = vld [vmem:[%s714_s1 + $0x48] sm:$0xff]  ;;  %v239_v7 = vld [vmem:[%s714_s1 + $0x40] sm:$0xff]  ;;  %v238_v8 = vld [vmem:[%s714_s1 + $0x38] sm:$0xff]  ;;  %s209_s26 = scalar_lea.vmem %s713_s0, %s659_s21  ;;  %s675_s5 = scalar_lea.vmem %s716_s3, %s659_s21 }
   0xe   : > { %492 = vmatprep.subr.mxu0 %v245_v1  ;;  %535 = vmatprep.subr.mxu1 %v245_v1  ;;  %v237_v9 = vld [vmem:[%s714_s1 + $0x30] sm:$0xff]  ;;  %v236_v10 = vld [vmem:[%s714_s1 + $0x28] sm:$0xff]  ;;  %v235_v11 = vld [vmem:[%s714_s1 + $0x20] sm:$0xff]  ;;  %s686_s10 = scalar_lea.vmem %s717_s4, %s659_s21 }
   0xf   : > { %493 = vmatpush3.msra.mxu0 %v245_v1  ;;  %551 = vmatpush3.msra.mxu1 %v245_v1  ;;  %v234_v12 = vld [vmem:[%s714_s1 + $0x18] sm:$0xff]  ;;  %v233_v13 = vld [vmem:[%s714_s1 + $0x10] sm:$0xff]  ;;  %v232_v14 = vld [vmem:[%s714_s1 + $0x8] sm:$0xff] }
  0x10   : > { %494 = vmatprep.subr.mxu0 %v244_v2  ;;  %536 = vmatprep.subr.mxu1 %v244_v2  ;;  %v231_v15 = vld [vmem:[%s714_s1] sm:$0xff]  ;;  %v224_v18 = vld [vmem:[%s209_s26 + $0x8] sm:$0xff]  ;;  %v225_v20 = vld [vmem:[%s209_s26 + $0x10] sm:$0xff] }
  0x11   : > { %495 = vmatpush3.msra.mxu0 %v244_v2  ;;  %552 = vmatpush3.msra.mxu1 %v244_v2  ;;  %v223_v16 = vld [vmem:[%s209_s26] sm:$0xff]  ;;  %v228_v19 = vld [vmem:[%s209_s26 + $0x28] sm:$0xff]  ;;  %v229_v21 = vld [vmem:[%s209_s26 + $0x30] sm:$0xff] }
  0x12   : > { %496 = vmatprep.subr.mxu0 %v243_v3  ;;  %537 = vmatprep.subr.mxu1 %v243_v3  ;;  %v227_v17 = vld [vmem:[%s209_s26 + $0x20] sm:$0xff]  ;;  %v226_v22 = vld [vmem:[%s209_s26 + $0x18] sm:$0xff]  ;;  %v360_v26 = vld [vmem:[%s675_s5 + $0x8] sm:$0xff] }
  0x13   : > { %497 = vmatpush3.msra.mxu0 %v243_v3  ;;  %553 = vmatpush3.msra.mxu1 %v243_v3  ;;  %v230_v23 = vld [vmem:[%s209_s26 + $0x38] sm:$0xff]  ;;  %v463_v24 = vld [vmem:[%s715_s2] ss:$0 sm:$0xff]  ;;  %v364_v28 = vld [vmem:[%s675_s5 + $0x28] sm:$0xff] }
  0x14   : > { %498 = vmatprep.subr.mxu0 %v242_v4  ;;  %538 = vmatprep.subr.mxu1 %v242_v4  ;;  %v359_v32 = vld [vmem:[%s675_s5] sm:$0xff]  ;;  %v362_v40 = vld [vmem:[%s675_s5 + $0x18] sm:$0xff]  ;;  %v361_v48 = vld [vmem:[%s675_s5 + $0x10] sm:$0xff] }
  0x15   : > { %499 = vmatpush3.msra.mxu0 %v242_v4  ;;  %554 = vmatpush3.msra.mxu1 %v242_v4  ;;  %v363_v34 = vld [vmem:[%s675_s5 + $0x20] sm:$0xff]  ;;  %v366_v42 = vld [vmem:[%s675_s5 + $0x38] sm:$0xff]  ;;  %v365_v50 = vld [vmem:[%s675_s5 + $0x30] sm:$0xff] }
  0x16   : > { %500 = vmatprep.subr.mxu0 %v241_v5  ;;  %539 = vmatprep.subr.mxu1 %v241_v5 }
  0x17   : > { %501 = vmatpush3.msra.mxu0 %v241_v5  ;;  %555 = vmatpush3.msra.mxu1 %v241_v5 }
  0x18   : > { %502 = vmatprep.subr.mxu0 %v240_v6  ;;  %540 = vmatprep.subr.mxu1 %v240_v6 }
  0x19   : > { %503 = vmatpush3.msra.mxu0 %v240_v6  ;;  %556 = vmatpush3.msra.mxu1 %v240_v6 }
  0x1a   : > { %504 = vmatprep.subr.mxu0 %v239_v7  ;;  %541 = vmatprep.subr.mxu1 %v239_v7 }
  0x1b   : > { %505 = vmatpush3.msra.mxu0 %v239_v7  ;;  %557 = vmatpush3.msra.mxu1 %v239_v7 }
  0x1c   : > { %506 = vmatprep.subr.mxu0 %v238_v8  ;;  %542 = vmatprep.subr.mxu1 %v238_v8 }
  0x1d   : > { %507 = vmatpush3.msra.mxu0 %v238_v8  ;;  %558 = vmatpush3.msra.mxu1 %v238_v8 }
  0x1e   : > { %508 = vmatprep.subr.mxu0 %v237_v9  ;;  %543 = vmatprep.subr.mxu1 %v237_v9 }
  0x1f   : > { %509 = vmatpush3.msra.mxu0 %v237_v9  ;;  %559 = vmatpush3.msra.mxu1 %v237_v9 }
  0x20   : > { %510 = vmatprep.subr.mxu0 %v236_v10  ;;  %544 = vmatprep.subr.mxu1 %v236_v10 }
  0x21   : > { %511 = vmatpush3.msra.mxu0 %v236_v10  ;;  %560 = vmatpush3.msra.mxu1 %v236_v10 }
  0x22   : > { %512 = vmatprep.subr.mxu0 %v235_v11  ;;  %545 = vmatprep.subr.mxu1 %v235_v11 }
  0x23   : > { %513 = vmatpush3.msra.mxu0 %v235_v11  ;;  %561 = vmatpush3.msra.mxu1 %v235_v11 }
  0x24   : > { %514 = vmatprep.subr.mxu0 %v234_v12  ;;  %546 = vmatprep.subr.mxu1 %v234_v12 }
  0x25   : > { %515 = vmatpush3.msra.mxu0 %v234_v12  ;;  %562 = vmatpush3.msra.mxu1 %v234_v12 }
  0x26   : > { %516 = vmatprep.subr.mxu0 %v233_v13  ;;  %547 = vmatprep.subr.mxu1 %v233_v13 }
  0x27   : > { %517 = vmatpush3.msra.mxu0 %v233_v13  ;;  %563 = vmatpush3.msra.mxu1 %v233_v13 }
  0x28   : > { %518 = vmatprep.subr.mxu0 %v232_v14  ;;  %548 = vmatprep.subr.mxu1 %v232_v14 }
  0x29   : > { %519 = vmatpush3.msra.mxu0 %v232_v14  ;;  %564 = vmatpush3.msra.mxu1 %v232_v14 }
  0x2a   : > { %520 = vmatprep.subr.mxu0 %v231_v15  ;;  %549 = vmatprep.subr.mxu1 %v231_v15 }
  0x2b   : > { %521 = vmatpush3.msra.mxu0 %v231_v15  ;;  %565 = vmatpush3.msra.mxu1 %v231_v15 }
  0x2c   : > { %522 = vmatprep.mubr.f32.mxu0 %v223_v16  ;;  %528 = vmatprep.mubr.f32.mxu1 %v227_v17 }
  0x2d   : > { %523 = vmatmul.mubr.f32.vlgmr.msra.gmra.mxu0 %v224_v18  ;;  %529 = vmatmul.mubr.f32.vlgmr.msra.gmra.mxu1 %v228_v19 }
  0x2e   : > { %525 = vmatprep.mubr.f32.mxu0 %v225_v20  ;;  %531 = vmatprep.mubr.f32.mxu1 %v229_v21 }
  0x31   : > { %526 = vmatmul.mubr.f32.gmra.mxu0 %v226_v22  ;;  %532 = vmatmul.mubr.f32.gmra.mxu1 %v230_v23 }
  0xed   : > { %v524_v25 = vpop.f32.mrf.mxu0  ;;  %v530_v27 = vpop.f32.mrf.mxu1 }
  0xee   : > { %v326_v29 = vadd.f32 %v524_v25, %v463_v24  ;;  %v346_v30 = vadd.f32 %v530_v27, %v463_v24 }
  0xef   : > { %v320_v31 = vpop.f32.mrf.mxu0  ;;  %v340_v33 = vpop.f32.mrf.mxu1 }
  0xf0   : > { %v368_v35 = vadd.f32 %v360_v26, %v326_v29  ;;  %v372_v36 = vadd.f32 %v364_v28, %v346_v30  ;;  %v321_v37 = vadd.f32 %v463_v24, %v320_v31  ;;  %v341_v38 = vadd.f32 %v463_v24, %v340_v33 }
  0xf1   : > { %v527_v39 = vpop.f32.mrf.mxu0  ;;  %v533_v41 = vpop.f32.mrf.mxu1 }
  0xf2   : > { %377 = vst.msk [vmem:[%s686_s10 + $0x8] sm:$0xff] %vm375_vm0, %v368_v35  ;;  %381 = vst.msk [vmem:[%s686_s10 + $0x28] sm:$0xff] %vm375_vm0, %v372_v36  ;;  %v367_v43 = vadd.f32 %v359_v32, %v321_v37  ;;  %v371_v44 = vadd.f32 %v363_v34, %v341_v38  ;;  %v336_v45 = vadd.f32 %v527_v39, %v463_v24 }
  0xf3   : > { %v356_v46 = vadd.f32 %v533_v41, %v463_v24  ;;  %v330_v47 = vpop.f32.mrf.mxu0  ;;  %v350_v49 = vpop.f32.mrf.mxu1 }
  0xf4   : > { %376 = vst.msk [vmem:[%s686_s10] sm:$0xff] %vm375_vm0, %v367_v43  ;;  %380 = vst.msk [vmem:[%s686_s10 + $0x20] sm:$0xff] %vm375_vm0, %v371_v44  ;;  %v370_v51 = vadd.f32 %v362_v40, %v336_v45  ;;  %v331_v53 = vadd.f32 %v463_v24, %v330_v47  ;;  %v351_v54 = vadd.f32 %v463_v24, %v350_v49 }
  0xf5   : > { %v374_v52 = vadd.f32 %v366_v42, %v356_v46 }
  0xf6   : > { %379 = vst.msk [vmem:[%s686_s10 + $0x18] sm:$0xff] %vm375_vm0, %v370_v51  ;;  %v369_v55 = vadd.f32 %v361_v48, %v331_v53  ;;  %v373_v56 = vadd.f32 %v365_v50, %v351_v54 }
  0xf7   : > { %383 = vst.msk [vmem:[%s686_s10 + $0x38] sm:$0xff] %vm375_vm0, %v374_v52 }
  0xf8   : > { %378 = vst.msk [vmem:[%s686_s10 + $0x10] sm:$0xff] %vm375_vm0, %v369_v55  ;;  %382 = vst.msk [vmem:[%s686_s10 + $0x30] sm:$0xff] %vm375_vm0, %v373_v56 }
  0xf9 PF: > { %s14_s15 = sadd.s32 1, %s580_s15  }
  0xfa   : > { %p11_p4 = scmp.ge.s32.totalorder %s14_s15, 4  }
  0xfc   :  { %13 = sbr.rel (!%p11_p4) target bundleno = 1 (0x1), region = 69 }

</bundles_post_ra>
